<compile_context>
chip_gen: v7x
topology: tpu7x:2x2x1
jax: 0.10.0
libtpu: 0.0.40
codegen_flags: <defaults>
</compile_context>

<pallas_src>
from collections import deque

import jax
import jax.numpy as jnp
from jax.experimental import pallas as pl
from jax.experimental.pallas import tpu as pltpu  # noqa: F401  (TPU backend)


# ---------------------------------------------------------------------------
# Fused Pallas kernel: one MXU matmul on the packed [K, 2*hidden] weight plus
# the elementwise scale branch.  Single full-array block (shapes are tiny and
# fit comfortably in VMEM), no grid.
# ---------------------------------------------------------------------------
def _fused_kernel(x_ref, w_ref, a_ref, b1_ref, sc_ref):
    x = x_ref[...]                                            # [M, K] f32
    # One MXU push on the packed bf16 weight; f32 accumulation.
    acc = jnp.dot(x.astype(jnp.bfloat16), w_ref[...],
                  preferred_element_type=jnp.float32)         # [M, 2*hidden]
    h = a_ref.shape[1]
    # w1 branch: relu(x @ w1); w2 branch: x @ w2.  Written as two separate
    # outputs so the wrapper needs no column-slice HLOs.
    a_ref[...] = jnp.maximum(acc[:, 0:h], 0.0)
    b1_ref[...] = acc[:, h:2 * h]
    # Elementwise scale branch reuses the same resident x tile (f32 math).
    sc_ref[...] = x * 2.0


def fused_forward(x2d, w_packed):
    """x2d: [M, K] f32, w_packed: [K, 2h] bf16 -> ([M,h] f32, [M,h] f32, [M,K] f32)."""
    m, k = x2d.shape
    n2 = w_packed.shape[1]
    h = n2 // 2
    flops = 2 * m * k * n2 + 2 * m * k          # matmul + relu/scale elementwise
    bytes_accessed = (m * k * 4) + (k * n2 * 2) + 2 * (m * h * 4) + (m * k * 4)
    a, b1, sc = pl.pallas_call(
        _fused_kernel,
        out_shape=(jax.ShapeDtypeStruct((m, h), jnp.float32),
                   jax.ShapeDtypeStruct((m, h), jnp.float32),
                   jax.ShapeDtypeStruct((m, k), jnp.float32)),
        in_specs=[pl.BlockSpec((m, k), lambda: (0, 0)),
                  pl.BlockSpec((k, n2), lambda: (0, 0))],
        out_specs=(pl.BlockSpec((m, h), lambda: (0, 0)),
                   pl.BlockSpec((m, h), lambda: (0, 0)),
                   pl.BlockSpec((m, k), lambda: (0, 0))),
        cost_estimate=pl.CostEstimate(flops=flops, transcendentals=0,
                                      bytes_accessed=bytes_accessed),
    )(x2d, w_packed)
    return a, b1, sc


fused_forward = jax.jit(fused_forward)


# ---------------------------------------------------------------------------
# Wrapped model (synthetic, deterministic weights) — produces nested outputs
# ---------------------------------------------------------------------------
class ToyModel:
    """Returns a nested dict/list structure of tensors, like a torch model might."""

    def __init__(self, in_features, hidden, key):
        k1, k2 = jax.random.split(key)
        scale = 1.0 / jnp.sqrt(in_features)
        self.hidden = hidden
        # Reference f32 weights (kept for numerics checks).
        self.w1 = jax.random.normal(k1, (in_features, hidden), jnp.float32) * scale
        self.w2 = jax.random.normal(k2, (in_features, hidden), jnp.float32) * scale
        # Packed bf16 weight operand: [K, 2*hidden]
        #   cols 0:hidden          -> w1
        #   cols hidden:2*hidden   -> w2
        # No structural zero padding (review: halve the dominant weight DMA).
        w_packed = jnp.concatenate([self.w1, self.w2], axis=1)
        self.w_packed = w_packed.astype(jnp.bfloat16)

    def __call__(self, x_nchw):
        b = x_nchw.shape[0]
        x2d = x_nchw.reshape(b, -1)                      # glue: NCHW -> [B, C*H*W]
        a, b1, sc = fused_forward(x2d, self.w_packed)    # single fused Pallas call
        b2 = sc.reshape(x_nchw.shape)                    # 2 * x          [B, C, H, W]
        # Nested output structure (dict of tensor / list-of-tensors)
        return {"a": a, "b": [b1, b2]}


# ---------------------------------------------------------------------------
# Flatten — exact semantics of torchf1.apputils.trace.flatten (BFS via deque)
# ---------------------------------------------------------------------------
def flatten(inputs):
    queue = deque([inputs])
    outputs = []
    while queue:
        x = queue.popleft()
        if isinstance(x, (list, tuple)):
            queue.extend(x)
        elif isinstance(x, dict):
            queue.extend(x.values())
        elif isinstance(x, jnp.ndarray):   # jax.Array leaf (== torch.Tensor role)
            outputs.append(x)
    return outputs


class Flatten:
    def __init__(self, model):
        self.model = model

    def __call__(self, *args, **kwargs):
        outputs = self.model(*args, **kwargs)
        return flatten(outputs)


# ---------------------------------------------------------------------------
if __name__ == "__main__":
    key = jax.random.PRNGKey(0)
    kx, kw = jax.random.split(key)

    B, C, H, W = 2, 4, 16, 16
    hidden = 32
    x = jax.random.normal(kx, (B, C, H, W), jnp.float32)   # layout: NCHW

    model = ToyModel(C * H * W, hidden, kw)
    flat_model = Flatten(model)

    outs = flat_model(x)
    outs = jax.block_until_ready(outs)

    # sanity: flat list of tensors in BFS order ("a" tensor, then "b"'s list)
    assert isinstance(outs, list) and len(outs) == 3
    assert outs[0].shape == (B, hidden)
    assert outs[1].shape == (B, hidden)
    assert outs[2].shape == (B, C, H, W)

    # numerics vs. plain-JAX reference (bf16 MXU operands -> loose tolerance)
    x2d = x.reshape(B, -1)
    a_ref = jnp.maximum(x2d @ model.w1, 0.0)
    b1_ref = x2d @ model.w2
    b2_ref = x * 2.0
    assert jnp.allclose(outs[0], a_ref, atol=8e-2, rtol=8e-2)
    assert jnp.allclose(outs[1], b1_ref, atol=8e-2, rtol=8e-2)
    assert jnp.allclose(outs[2], b2_ref, atol=1e-6, rtol=1e-6)

    print("KERNEL_OK")
</pallas_src>

<mosaic_0001>
module attributes {stable_mosaic.version = 11 : i64} {
  func.func @_fused_kernel(%arg0: memref<2x1024xf32, #tpu.memory_space<vmem>>, %arg1: memref<1024x64xbf16, #tpu.memory_space<vmem>>, %arg2: memref<2x32xf32, #tpu.memory_space<vmem>>, %arg3: memref<2x32xf32, #tpu.memory_space<vmem>>, %arg4: memref<2x1024xf32, #tpu.memory_space<vmem>>) attributes {dimension_semantics = [], scalar_prefetch = 0 : i64, scratch_operands = 0 : i64, tpu.core_type = #tpu.core_type<tc>} {
    %c0 = arith.constant 0 : index
    %c0_0 = arith.constant 0 : index
    %0 = vector.load %arg0[%c0, %c0_0] : memref<2x1024xf32, #tpu.memory_space<vmem>>, vector<2x1024xf32>
    %1 = arith.truncf %0 : vector<2x1024xf32> to vector<2x1024xbf16>
    %c0_1 = arith.constant 0 : index
    %c0_2 = arith.constant 0 : index
    %2 = vector.load %arg1[%c0_1, %c0_2] : memref<1024x64xbf16, #tpu.memory_space<vmem>>, vector<1024x64xbf16>
    %cst = arith.constant dense<0.000000e+00> : vector<2x64xf32>
    %3 = tpu.matmul %1, %2, %cst {dimension_numbers = #tpu.dot_dimension_numbers<[1], [0], [0], [1], [0, 0, 1, 1], [], []>} : vector<2x1024xbf16>, vector<1024x64xbf16>, vector<2x64xf32> -> vector<2x64xf32>
    %4 = vector.extract_strided_slice %3 {offsets = [0, 0], sizes = [2, 32], strides = [1, 1]} : vector<2x64xf32> to vector<2x32xf32>
    %cst_3 = arith.constant 0.000000e+00 : f32
    %5 = vector.broadcast %cst_3 : f32 to vector<2x32xf32>
    %6 = arith.maximumf %4, %5 : vector<2x32xf32>
    %c0_4 = arith.constant 0 : index
    %c0_5 = arith.constant 0 : index
    %7 = vector.load %arg2[%c0_4, %c0_5] : memref<2x32xf32, #tpu.memory_space<vmem>>, vector<2x32xf32>
    tpu.vector_store %arg2[%c0_4, %c0_5], %6 {strides = array<i32>} : memref<2x32xf32, #tpu.memory_space<vmem>>, vector<2x32xf32>,
    %8 = vector.extract_strided_slice %3 {offsets = [0, 32], sizes = [2, 32], strides = [1, 1]} : vector<2x64xf32> to vector<2x32xf32>
    %c0_6 = arith.constant 0 : index
    %c0_7 = arith.constant 0 : index
    %9 = vector.load %arg3[%c0_6, %c0_7] : memref<2x32xf32, #tpu.memory_space<vmem>>, vector<2x32xf32>
    tpu.vector_store %arg3[%c0_6, %c0_7], %8 {strides = array<i32>} : memref<2x32xf32, #tpu.memory_space<vmem>>, vector<2x32xf32>,
    %cst_8 = arith.constant 2.000000e+00 : f32
    %10 = vector.broadcast %cst_8 : f32 to vector<2x1024xf32>
    %11 = arith.mulf %0, %10 : vector<2x1024xf32>
    %c0_9 = arith.constant 0 : index
    %c0_10 = arith.constant 0 : index
    %12 = vector.load %arg4[%c0_9, %c0_10] : memref<2x1024xf32, #tpu.memory_space<vmem>>, vector<2x1024xf32>
    tpu.vector_store %arg4[%c0_9, %c0_10], %11 {strides = array<i32>} : memref<2x1024xf32, #tpu.memory_space<vmem>>, vector<2x1024xf32>,
    return
  }
}

</mosaic_0001>

<bundles_post_ra>
// kernel: fused_forward.1
= control target key start
LH: loop header
LB: loop body
LE: loop exit
PB: predicated region body
PF: predicated region fallthrough
CT: control target
= control target key end

     0   :  { %10 = vsyncpa [#allocation3], 0  ;;  %v25_v28 = vlaneseq  ;;  %v1089_v36 = vmov 1983009808   ;;  %s1367_s0 = inlined_call_operand.vmem [shape: f32[2,1024], index: 0, kind: input, shape index: {}]   ;;  %s1368_s1 = inlined_call_operand.vmem [shape: bf16[1024,64], index: 1, kind: input, shape index: {}]   ;;  %s1369_s2 = inlined_call_operand.hbm [shape: f32[2,32], index: 2, kind: output, shape index: {0}]   ;;  %s1370_s3 = inlined_call_operand.hbm [shape: f32[2,32], index: 3, kind: output, shape index: {1}]   ;;  %s1371_s4 = inlined_call_operand.hbm [shape: f32[2,1024], index: 4, kind: output, shape index: {2}]  }
   0x1   :  { %v953_v0 = vld [vmem:[%s1368_s1 + $0x40] sm:$0xff]   ;;  %v957_v4 = vld [vmem:[%s1368_s1 + $0x48] sm:$0xff]   ;;  %v961_v8 = vld [vmem:[%s1368_s1 + $0x50] sm:$0xff]   ;;  %v23_v37 = vunpack.c.l.s4 %v1089_v36 }
   0x2   :  { %v954_v1 = vld [vmem:[%s1368_s1 + $0xc0] sm:$0xff]   ;;  %860 = vmatprep.subr.bf16.mxu0 %v953_v0  ;;  %v958_v5 = vld [vmem:[%s1368_s1 + $0xc8] sm:$0xff]   ;;  %v962_v9 = vld [vmem:[%s1368_s1 + $0xd0] sm:$0xff]   ;;  %v26_v33 = vshrl.u32 %v25_v28, 7 }
   0x3   :  { %v955_v2 = vld [vmem:[%s1368_s1] sm:$0xff]   ;;  %882 = vmatprep.subr.bf16.mxu1 %v954_v1  ;;  %v959_v6 = vld [vmem:[%s1368_s1 + $0x8] sm:$0xff]   ;;  %v963_v10 = vld [vmem:[%s1368_s1 + $0x10] sm:$0xff]   ;;  %v24_v39 = vunpack.c.0.s8 %v23_v37 }
   0x4   :  { %v956_v3 = vld [vmem:[%s1368_s1 + $0x80] sm:$0xff]   ;;  %861 = vmatpush3.bf16.msra.mxu0 %v955_v2  ;;  %v960_v7 = vld [vmem:[%s1368_s1 + $0x88] sm:$0xff]   ;;  %v964_v11 = vld [vmem:[%s1368_s1 + $0x90] sm:$0xff]  }
   0x5   :  { %883 = vmatpush3.bf16.msra.mxu1 %v956_v3  ;;  %862 = vmatprep.subr.bf16.mxu0 %v957_v4  ;;  %v965_v12 = vld [vmem:[%s1368_s1 + $0x58] sm:$0xff]   ;;  %v969_v16 = vld [vmem:[%s1368_s1 + $0x60] sm:$0xff]   ;;  %v973_v20 = vld [vmem:[%s1368_s1 + $0x68] sm:$0xff]   ;;  %v1228_v41 = vsub.s32 %v24_v39, %v26_v33 }
   0x6   :  { %884 = vmatprep.subr.bf16.mxu1 %v958_v5  ;;  %v966_v13 = vld [vmem:[%s1368_s1 + $0xd8] sm:$0xff]   ;;  %v970_v17 = vld [vmem:[%s1368_s1 + $0xe0] sm:$0xff]   ;;  %v974_v21 = vld [vmem:[%s1368_s1 + $0xe8] sm:$0xff]  }
   0x7   :  { %v967_v14 = vld [vmem:[%s1368_s1 + $0x18] sm:$0xff]   ;;  %v971_v18 = vld [vmem:[%s1368_s1 + $0x20] sm:$0xff]   ;;  %v975_v22 = vld [vmem:[%s1368_s1 + $0x28] sm:$0xff]  }
   0x8   :  { %863 = vmatpush3.bf16.msra.mxu0 %v959_v6  ;;  %v968_v15 = vld [vmem:[%s1368_s1 + $0x98] sm:$0xff]   ;;  %v972_v19 = vld [vmem:[%s1368_s1 + $0xa0] sm:$0xff]   ;;  %v976_v23 = vld [vmem:[%s1368_s1 + $0xa8] sm:$0xff]  }
   0x9   :  { %885 = vmatpush3.bf16.msra.mxu1 %v960_v7  ;;  %864 = vmatprep.subr.bf16.mxu0 %v961_v8  ;;  %v977_v24 = vld [vmem:[%s1368_s1 + $0x70] sm:$0xff]   ;;  %v981_v29 = vld [vmem:[%s1368_s1 + $0x78] sm:$0xff]   ;;  %v1218_v34 = vld [vmem:[%s1367_s0] sm:$0xff] }
   0xa   :  { %886 = vmatprep.subr.bf16.mxu1 %v962_v9  ;;  %v978_v25 = vld [vmem:[%s1368_s1 + $0xf0] sm:$0xff]   ;;  %v982_v30 = vld [vmem:[%s1368_s1 + $0xf8] sm:$0xff]   ;;  %v986_v35 = vld [vmem:[%s1368_s1 + $0x140] sm:$0xff]   ;;  %v21_v40 = vcombine.high %v1218_v34, %v1218_v34  ;;  %v28_v42 = vrot.slane %v1218_v34, %v1228_v41 }
   0xb   :  { %v979_v26 = vld [vmem:[%s1368_s1 + $0x30] sm:$0xff]   ;;  %v983_v31 = vld [vmem:[%s1368_s1 + $0x38] sm:$0xff]   ;;  %v987_v38 = vld [vmem:[%s1368_s1 + $0x1c0] sm:$0xff]  }
   0xc   :  { %865 = vmatpush3.bf16.msra.mxu0 %v963_v10  ;;  %v980_v27 = vld [vmem:[%s1368_s1 + $0xb0] sm:$0xff]   ;;  %v984_v32 = vld [vmem:[%s1368_s1 + $0xb8] sm:$0xff]   ;;  %v35_v43 = vrot.slane %v21_v40, %v1228_v41  ;;  %v36_v44 = vcombine.high %v28_v42, %v28_v42  ;;  %v988_v46 = vld [vmem:[%s1368_s1 + $0x100] sm:$0xff]   ;;  %v63_v47 = vpack.c.bf16 %v28_v42, %v28_v42 }
   0xd   :  { %887 = vmatpush3.bf16.msra.mxu1 %v964_v11  ;;  %866 = vmatprep.subr.bf16.mxu0 %v965_v12  ;;  %v989_v49 = vld [vmem:[%s1368_s1 + $0x180] sm:$0xff]   ;;  %v990_v52 = vld [vmem:[%s1368_s1 + $0x148] sm:$0xff]   ;;  %v994_v56 = vld [vmem:[%s1368_s1 + $0x150] sm:$0xff]  }
   0xe   :  { %888 = vmatprep.subr.bf16.mxu1 %v966_v13  ;;  %v37_v45 = vcombine.high %v35_v43, %v35_v43  ;;  %v65_v48 = vpack.c.bf16 %v35_v43, %v35_v43  ;;  %v64_v50 = vpack.c.bf16 %v36_v44, %v36_v44  ;;  %v991_v53 = vld [vmem:[%s1368_s1 + $0x1c8] sm:$0xff]   ;;  %v995_v57 = vld [vmem:[%s1368_s1 + $0x1d0] sm:$0xff]   ;;  %v998_v60 = vld [vmem:[%s1368_s1 + $0x158] sm:$0xff]  }
   0xf   :  { %v992_v54 = vld [vmem:[%s1368_s1 + $0x108] sm:$0xff]   ;;  %v996_v58 = vld [vmem:[%s1368_s1 + $0x110] sm:$0xff]   ;;  %v999_v61 = vld [vmem:[%s1368_s1 + $0x1d8] sm:$0xff]  }
  0x10   :  { %867 = vmatpush3.bf16.msra.mxu0 %v967_v14  ;;  %v66_v51 = vpack.c.bf16 %v37_v45, %v37_v45  ;;  %615 = vmatprep.mubr.bf16.mxu0 %v64_v50  ;;  %v993_v55 = vld [vmem:[%s1368_s1 + $0x188] sm:$0xff]   ;;  %v997_v59 = vld [vmem:[%s1368_s1 + $0x190] sm:$0xff]   ;;  %v1000_v62 = vld [vmem:[%s1368_s1 + $0x118] sm:$0xff]  }
  0x11   :  { %889 = vmatpush3.bf16.msra.mxu1 %v968_v15  ;;  %868 = vmatprep.subr.bf16.mxu0 %v969_v16  ;;  %v1001_v63 = vld [vmem:[%s1368_s1 + $0x198] sm:$0xff]   ;;  %v1002_v0 = vld [vmem:[%s1368_s1 + $0x160] sm:$0xff]   ;;  %v1006_v4 = vld [vmem:[%s1368_s1 + $0x168] sm:$0xff]  }
  0x12   :  { %890 = vmatprep.subr.bf16.mxu1 %v970_v17  ;;  %655 = vmatprep.mubr.bf16.mxu1 %v66_v51  ;;  %v1003_v1 = vld [vmem:[%s1368_s1 + $0x1e0] sm:$0xff]   ;;  %v1007_v5 = vld [vmem:[%s1368_s1 + $0x1e8] sm:$0xff]   ;;  %v1010_v8 = vld [vmem:[%s1368_s1 + $0x170] sm:$0xff]  }
  0x13   :  { %v1004_v2 = vld [vmem:[%s1368_s1 + $0x120] sm:$0xff]   ;;  %v1008_v6 = vld [vmem:[%s1368_s1 + $0x128] sm:$0xff]   ;;  %v1011_v9 = vld [vmem:[%s1368_s1 + $0x1f0] sm:$0xff]  }
  0x14   :  { %869 = vmatpush3.bf16.msra.mxu0 %v971_v18  ;;  %v1005_v3 = vld [vmem:[%s1368_s1 + $0x1a0] sm:$0xff]   ;;  %v1009_v7 = vld [vmem:[%s1368_s1 + $0x1a8] sm:$0xff]  }
  0x15   :  { %891 = vmatpush3.bf16.msra.mxu1 %v972_v19  ;;  %870 = vmatprep.subr.bf16.mxu0 %v973_v20  ;;  %v18_v10 = vld [vmem:[%s1367_s0 + $0x8] sm:$0xff] }
  0x16   :  { %892 = vmatprep.subr.bf16.mxu1 %v974_v21 }
  0x18   :  { %871 = vmatpush3.bf16.msra.mxu0 %v975_v22 }
  0x19   :  { %893 = vmatpush3.bf16.msra.mxu1 %v976_v23  ;;  %872 = vmatprep.subr.bf16.mxu0 %v977_v24 }
  0x1a   :  { %894 = vmatprep.subr.bf16.mxu1 %v978_v25 }
  0x1c   :  { %873 = vmatpush3.bf16.msra.mxu0 %v979_v26 }
  0x1d   :  { %895 = vmatpush3.bf16.msra.mxu1 %v980_v27  ;;  %874 = vmatprep.subr.bf16.mxu0 %v981_v29 }
  0x1e   :  { %896 = vmatprep.subr.bf16.mxu1 %v982_v30 }
  0x20   :  { %875 = vmatpush3.bf16.msra.mxu0 %v983_v31 }
  0x21   :  { %897 = vmatpush3.bf16.msra.mxu1 %v984_v32  ;;  %904 = vmatprep.subr.bf16.mxu0 %v986_v35 }
  0x22   :  { %926 = vmatprep.subr.bf16.mxu1 %v987_v38 }
  0x23   :  { %616 = vmatmul.mubr.bf16.vlgmr.msra.gmra.mrb[0].mxu0 %v63_v47 }
  0x24   :  { %656 = vmatmul.mubr.bf16.vlgmr.msra.gmra.mrb[0].mxu1 %v65_v48  ;;  %905 = vmatpush3.bf16.msra.mxu0 %v988_v46 }
  0x25   :  { %927 = vmatpush3.bf16.msra.mxu1 %v989_v49  ;;  %906 = vmatprep.subr.bf16.mxu0 %v990_v52 }
  0x26   :  { %928 = vmatprep.subr.bf16.mxu1 %v991_v53 }
  0x28   :  { %907 = vmatpush3.bf16.msra.mxu0 %v992_v54 }
  0x29   :  { %929 = vmatpush3.bf16.msra.mxu1 %v993_v55  ;;  %908 = vmatprep.subr.bf16.mxu0 %v994_v56 }
  0x2a   :  { %930 = vmatprep.subr.bf16.mxu1 %v995_v57 }
  0x2c   :  { %909 = vmatpush3.bf16.msra.mxu0 %v996_v58 }
  0x2d   :  { %931 = vmatpush3.bf16.msra.mxu1 %v997_v59  ;;  %910 = vmatprep.subr.bf16.mxu0 %v998_v60 }
  0x2e   :  { %932 = vmatprep.subr.bf16.mxu1 %v999_v61 }
  0x30   :  { %911 = vmatpush3.bf16.msra.mxu0 %v1000_v62 }
  0x31   :  { %933 = vmatpush3.bf16.msra.mxu1 %v1001_v63  ;;  %912 = vmatprep.subr.bf16.mxu0 %v1002_v0 }
  0x32   :  { %934 = vmatprep.subr.bf16.mxu1 %v1003_v1 }
  0x34   :  { %913 = vmatpush3.bf16.msra.mxu0 %v1004_v2 }
  0x35   :  { %935 = vmatpush3.bf16.msra.mxu1 %v1005_v3  ;;  %914 = vmatprep.subr.bf16.mxu0 %v1006_v4 }
  0x36   :  { %936 = vmatprep.subr.bf16.mxu1 %v1007_v5 }
  0x37   :  { %11 = vsyncpa [#allocation5], 0  ;;  %v45_v11 = vrot.slane %v18_v10, %v1228_v41  ;;  %v38_v12 = vcombine.high %v18_v10, %v18_v10  ;;  %v1012_v13 = vld [vmem:[%s1368_s1 + $0x130] sm:$0xff]   ;;  %v1014_v17 = vld [vmem:[%s1368_s1 + $0x178] sm:$0xff]   ;;  %v751_v38 = vmul.f32 2.0, %v1218_v34  ;;  %v752_v39 = vmul.f32 2.0, %v18_v10 }
  0x38   :  { %915 = vmatpush3.bf16.msra.mxu0 %v1008_v6  ;;  %v1013_v14 = vld [vmem:[%s1368_s1 + $0x1b0] sm:$0xff]   ;;  %v1015_v18 = vld [vmem:[%s1368_s1 + $0x1f8] sm:$0xff]   ;;  %vm744_vm0 = vcmask 254976   ;;  %s1091_s17 = smov 96  }
  0x39   :  { %937 = vmatpush3.bf16.msra.mxu1 %v1009_v7  ;;  %v53_v15 = vcombine.high %v45_v11, %v45_v11  ;;  %v52_v16 = vrot.slane %v38_v12, %v1228_v41  ;;  %916 = vmatprep.subr.bf16.mxu0 %v1010_v8  ;;  %v1016_v21 = vld [vmem:[%s1368_s1 + $0x138] sm:$0xff]   ;;  %v67_v24 = vpack.c.bf16 %v45_v11, %v45_v11 }
  0x3a   :  { %938 = vmatprep.subr.bf16.mxu1 %v1011_v9  ;;  %v1017_v22 = vld [vmem:[%s1368_s1 + $0x1b8] sm:$0xff]   ;;  %753 = vst [vmem:[#allocation6] sm:$0xff] %v751_v38  ;;  %754 = vst [vmem:[#allocation6 + $0x8] sm:$0xff] %v752_v39  ;;  %s1090_s1 = smov [#allocation2]  }
  0x3b   :  { %v68_v19 = vpack.c.bf16 %v53_v15, %v53_v15  ;;  %v54_v20 = vcombine.high %v52_v16, %v52_v16  ;;  %v69_v25 = vpack.c.bf16 %v52_v16, %v52_v16  ;;  %s761_s16 = sshll.u32 %s1090_s1, 4  ;;  %s762_s16 = int_to_ptr.vmem [resolvable:$true] %s761_s16 }
  0x3c   :  { %917 = vmatpush3.bf16.msra.mxu0 %v1012_v13  ;;  %s1019_s18 = scalar_lea.vmem %s762_s16, 32  ;;  %p1024_p1 = scmp.lt.s32.totalorder %s762_s16, %s762_s16 }
  0x3d   :  { %939 = vmatpush3.bf16.msra.mxu1 %v1013_v14  ;;  %v70_v23 = vpack.c.bf16 %v54_v20, %v54_v20  ;;  %918 = vmatprep.subr.bf16.mxu0 %v1014_v17  ;;  %p1020_p0 = scmp.ne.s32.totalorder %s762_s16, %s1019_s18  ;;  %p1025_p2 = scmp.lt.s32.totalorder %s1019_s18, %s1019_s18 }
  0x3e   :  { %940 = vmatprep.subr.bf16.mxu1 %v1015_v18  ;;  %695 = vmatprep.mubr.bf16.mxu0 %v68_v19 }
  0x3f   :  { %735 = vmatprep.mubr.bf16.mxu1 %v70_v23  ;;  %p1026_p3 = por %p1025_p2, %p1024_p1 }
  0x40   :  { %919 = vmatpush3.bf16.msra.mxu0 %v1016_v21 }
  0x41   :  { %941 = vmatpush3.bf16.msra.mxu1 %v1017_v22  ;;  %p1027_p4 = pnand %p1026_p3, %p1020_p0 }
  0x43   :  { %696 = vmatmul.mubr.bf16.vlgmr.msra.gmra.mrb[4].mxu0 %v67_v24 }
  0x44   :  { %736 = vmatmul.mubr.bf16.vlgmr.msra.gmra.mrb[4].mxu1 %v69_v25 }
  0xf6   :  { %v876_v26 = vpop.f32.mrb[0].mxu0 }
  0xf7   :  { %v898_v27 = vpop.f32.mrb[0].mxu1  ;;  %v877_v28 = vpop.f32.mrb[1].mxu0 }
  0xf8   :  { %v899_v29 = vpop.f32.mrb[1].mxu1  ;;  %v878_v30 = vadd.f32 %v877_v28, %v876_v26  ;;  %v879_v32 = vpop.f32.mrb[2].mxu0 }
  0xf9   :  { %v900_v31 = vadd.f32 %v899_v29, %v898_v27  ;;  %v901_v33 = vpop.f32.mrb[2].mxu1  ;;  %v880_v35 = vpop.f32.mrb[3].mxu0 }
  0xfa   :  { %v902_v36 = vpop.f32.mrb[3].mxu1 }
  0xfb   :  { %v658_v37 = vadd.f32 %v900_v31, %v878_v30 }
 0x116   :  { %v920_v40 = vpop.f32.mrb[4].mxu0 }
 0x117   :  { %v942_v41 = vpop.f32.mrb[4].mxu1  ;;  %v921_v42 = vpop.f32.mrb[5].mxu0 }
 0x118   :  { %v943_v43 = vpop.f32.mrb[5].mxu1  ;;  %v922_v44 = vadd.f32 %v921_v42, %v920_v40  ;;  %v923_v46 = vpop.f32.mrb[6].mxu0 }
 0x119   :  { %v944_v45 = vadd.f32 %v943_v43, %v942_v41  ;;  %v945_v47 = vpop.f32.mrb[6].mxu1  ;;  %v924_v48 = vpop.f32.mrb[7].mxu0 }
 0x11a   :  { %v946_v49 = vpop.f32.mrb[7].mxu1  ;;  %v698_v50 = vadd.f32 %v922_v44, %v658_v37 }
 0x11c   :  { %v738_v51 = vadd.f32 %v944_v45, %v698_v50 }
 0x11e   :  { %747 = vrot.lane.b32.xlu0 %v738_v51, %s1091_s17  ;;  %v743_v34 = vmax.f32 %v738_v51, 0.0 }
 0x120   :  { %745 = vst.msk [vmem:[#allocation2] sm:$0x3] %vm744_vm0, %v743_v34 }
 0x121   :  { %1030 = shalt.err (!%p1027_p4)
}
 0x122   :  { %s1031_s21 = scalar_lea.hbm %s1369_s2, 32 }
 0x123   :  { %p1032_p5 = scmp.ne.s32.totalorder %s1369_s2, %s1031_s21  ;;  %p1035_p6 = scmp.lt.u32.totalorder %s1031_s21, %s1369_s2 }
 0x125   :  { %p1037_p7 = pnand %p1035_p6, %p1032_p5 }
 0x127   :  { %1040 = shalt.err (!%p1037_p7)
}
 0x128   :  { %764 = dma.vmem_to_hbm [thread:$0]  %s762_s16, 32, %s1369_s2, [#allocation3]  }
 0x129   :  { %s1092_s28 = smov [#allocation4]   ;;  %s1093_s30 = smov [#allocation6]  }
 0x12a   :  { %s771_s29 = sshll.u32 %s1092_s28, 4  ;;  %s781_s5 = sshll.u32 %s1093_s30, 4  ;;  %s772_s29 = int_to_ptr.vmem [resolvable:$true] %s771_s29  ;;  %s782_s5 = int_to_ptr.vmem [resolvable:$true] %s781_s5 }
 0x12b   :  { %s1041_s6 = scalar_lea.vmem %s772_s29, 32  ;;  %p1046_p9 = scmp.lt.s32.totalorder %s772_s29, %s772_s29 }
 0x12c   :  { %p1042_p8 = scmp.ne.s32.totalorder %s772_s29, %s1041_s6  ;;  %p1047_p10 = scmp.lt.s32.totalorder %s1041_s6, %s1041_s6 }
 0x12e   :  { %p1048_p11 = por %p1047_p10, %p1046_p9 }
 0x130   :  { %p1049_p12 = pnand %p1048_p11, %p1042_p8 }
 0x190   :  { %v748_v52 = vpop.permute.xlu0 %747 }
 0x191   :  { %750 = vst.msk [vmem:[#allocation4] sm:$0x3] %vm744_vm0, %v748_v52 }
 0x192   :  { %1052 = shalt.err (!%p1049_p12)
}
 0x193   :  { %s1053_s2 = scalar_lea.hbm %s1370_s3, 32 }
 0x194   :  { %p1054_p13 = scmp.ne.s32.totalorder %s1370_s3, %s1053_s2  ;;  %p1057_p0 = scmp.lt.u32.totalorder %s1053_s2, %s1370_s3 }
 0x196   :  { %p1059_p1 = pnand %p1057_p0, %p1054_p13 }
 0x198   :  { %1062 = shalt.err (!%p1059_p1)
}
 0x199   :  { %774 = dma.vmem_to_hbm [thread:$0]  %s772_s29, 32, %s1370_s3, [#allocation5]  }
 0x19a   :  { %s1063_s14 = scalar_lea.vmem %s782_s5, 256  ;;  %p1068_p3 = scmp.lt.s32.totalorder %s782_s5, %s782_s5 }
 0x19b   :  { %p1064_p2 = scmp.ne.s32.totalorder %s782_s5, %s1063_s14  ;;  %p1069_p4 = scmp.lt.s32.totalorder %s1063_s14, %s1063_s14 }
 0x19d   :  { %p1070_p5 = por %p1069_p4, %p1068_p3 }
 0x19f   :  { %p1071_p6 = pnand %p1070_p5, %p1064_p2 }
 0x1a1   :  { %1074 = shalt.err (!%p1071_p6)
}
 0x1a2   :  { %s1075_s16 = scalar_lea.hbm %s1371_s4, 256 }
 0x1a3   :  { %p1076_p7 = scmp.ne.s32.totalorder %s1371_s4, %s1075_s16  ;;  %p1079_p8 = scmp.lt.u32.totalorder %s1075_s16, %s1371_s4 }
 0x1a5   :  { %p1081_p9 = pnand %p1079_p8, %p1076_p7 }
 0x1a7   :  { %1084 = shalt.err (!%p1081_p9)
}
 0x1a8   :  { %784 = dma.vmem_to_hbm [thread:$0]  %s782_s5, 256, %s1371_s4, [#allocation5]  }
 0x1a9   :  { %1085 = dma.done.wait [#allocation3], 32  }
 0x1aa   :  { %1086 = vsyncadd [#allocation3], 4294967264 }
 0x1ab   :  { %1087 = dma.done.wait [#allocation5], 288  }
 0x1ac   :  { %1088 = vsyncadd [#allocation5], 4294967008 }
 0x1ad   :  { %794 = vsyncpa [#allocation3], 1 }
 0x1ae   :  { %795 = vsyncpa [#allocation5], 1 }

</bundles_post_ra>
